<compile_context>
chip_gen: v5e
topology: v5e:2x2
jax: 0.10.0
libtpu: 0.0.40
codegen_flags: <defaults>
</compile_context>

<pallas_src>
import jax
import jax.numpy as jnp
from jax.experimental import pallas as pl
from jax.experimental.pallas import tpu as pltpu  # noqa: F401  (kept for parity)


def init_params(key, input_size=1, hidden_size=2, output_size=1):
    """Deterministic synthetic parameters with PyTorch-like uniform init."""
    H = hidden_size
    bound = 1.0 / (H ** 0.5)
    keys = jax.random.split(key, 10)

    def u(k_, shape):
        return jax.random.uniform(k_, shape, jnp.float32, -bound, bound)

    W_ih_l0 = u(keys[0], (4 * H, input_size))
    W_hh_l0 = u(keys[1], (4 * H, H))
    b_ih_l0 = u(keys[2], (4 * H,))
    b_hh_l0 = u(keys[3], (4 * H,))
    W_ih_l1 = u(keys[4], (4 * H, H))
    W_hh_l1 = u(keys[5], (4 * H, H))
    b_ih_l1 = u(keys[6], (4 * H,))
    b_hh_l1 = u(keys[7], (4 * H,))
    W_lin = u(keys[8], (output_size, H))
    b_lin = u(keys[9], (output_size,))

    # Glue: pre-transpose weights to (in, out) and fold the two bias vectors.
    return (
        W_ih_l0.T,                                   # (I, 4H)
        W_hh_l0.T,                                   # (H, 4H)
        (b_ih_l0 + b_hh_l0).reshape(1, 4 * H),       # (1, 4H)
        W_ih_l1.T,                                   # (H, 4H)  (reference only)
        W_hh_l1.T,                                   # (H, 4H)  (reference only)
        (b_ih_l1 + b_hh_l1).reshape(1, 4 * H),       # (1, 4H)  (reference only)
        W_lin.T,                                     # (H, O)
        b_lin.reshape(1, output_size),               # (1, O)
    )


def _pack_params(wih0, whh0, b0, wlin, blin):
    """Pack layer-0 LSTM params + head into one (R_pad, 4H) f32 slab.

    Row layout (G = 4H):
      [0      : I        ]  W_ih^T   (I, G)
      [I      : I+H      ]  W_hh^T   (H, G)
      [I+H               ]  b_ih+b_hh (G,)
      [I+H+1  : I+2H+1   ]  W_lin^T  (H, O), zero-padded to width G
      [I+2H+1            ]  b_lin    (O,),   zero-padded to width G
    """
    I, G = wih0.shape
    H = whh0.shape[0]
    O = wlin.shape[1]
    assert G == 4 * H and O <= G
    R = I + 2 * H + 2
    R_pad = ((R + 7) // 8) * 8
    slab = jnp.zeros((R_pad, G), jnp.float32)
    slab = slab.at[0:I, :].set(wih0)
    slab = slab.at[I:I + H, :].set(whh0)
    slab = slab.at[I + H, :].set(b0.reshape(G))
    slab = slab.at[I + H + 1:I + 2 * H + 1, 0:O].set(wlin)
    slab = slab.at[I + 2 * H + 1, 0:O].set(blin.reshape(O))
    return slab


def _make_kernel(S, B, I, H, O):
    G = 4 * H

    def kernel(x_ref, p_ref, out_ref):
        # Load both operands exactly once; they stay resident in vregs/VMEM.
        p = p_ref[...]                 # (R_pad, G)  packed parameter slab
        x_all = x_ref[...]             # (S, B, I)   time-major input

        # Static slices of the slab (zero runtime cost).
        wih = p[0:I, :]                                        # (I, G)
        whh_rows = [p[I + k:I + k + 1, :] for k in range(H)]   # H x (1, G)
        b = p[I + H:I + H + 1, :]                              # (1, G)
        wlin_rows = [p[I + H + 1 + k:I + H + 2 + k, :]
                     for k in range(H)]                        # H x (1, G)
        blin = p[I + 2 * H + 1:I + 2 * H + 2, :]               # (1, G)

        # One-shot input projection for all timesteps: gx[t] = x_t @ W_ih + b.
        # I is tiny (==1 here) so this is pure VPU broadcast MACs, no MXU.
        gx = x_all[:, :, 0:1] * wih[0:1, :]                    # (S, B, G)
        for k in range(1, I):
            gx = gx + x_all[:, :, k:k + 1] * wih[k:k + 1, :]
        gx = gx + b                                            # (S, B, G)

        h = jnp.zeros((B, H), jnp.float32)
        c = jnp.zeros((B, H), jnp.float32)

        # Serial layer-0 recurrence (S static & small -> fully unrolled).
        # Per step: H broadcast MACs (VPU) + 2 full-vreg transcendentals (EUP)
        # + a handful of elementwise ops. No MXU on the critical path.
        for t in range(S):
            gates = gx[t]                                      # (B, G)
            for k in range(H):
                gates = gates + h[:, k:k + 1] * whh_rows[k]    # VPU MAC
            sig = jax.nn.sigmoid(gates)                        # one EUP pass
            th = jnp.tanh(gates)                               # one EUP pass
            # PyTorch gate order: i, f, g, o
            i_g = sig[:, 0 * H:1 * H]
            f_g = sig[:, 1 * H:2 * H]
            g_g = th[:, 2 * H:3 * H]
            o_g = sig[:, 3 * H:4 * H]
            c = f_g * c + i_g * g_g
            h = o_g * jnp.tanh(c)

        # Linear head on layer-0's final hidden state (h_out[0] in PyTorch),
        # again as VPU broadcast MACs (padded columns of W_lin/b_lin are 0).
        pred = blin                                            # (1, G)
        for k in range(H):
            pred = pred + h[:, k:k + 1] * wlin_rows[k]         # (B, G)
        out_ref[...] = pred[:, 0:O].astype(out_ref.dtype)

    return kernel


def lstm_forecast_forward(x, params):
    """x: (B, S, I) float32 -> prediction (B, O) float32."""
    wih0, whh0, b0, _wih1, _whh1, _b1, wlin, blin = params
    B, S, I = x.shape
    H = whh0.shape[0]
    O = wlin.shape[1]

    # Collapse the 5 parameter operands into a single DMA'd slab, and present
    # x time-major so per-step reads are leading-dim indices (layout plumbing
    # only -- no compute hoisted out of the kernel).
    slab = _pack_params(wih0, whh0, b0, wlin, blin)
    x_tm = jnp.transpose(x, (1, 0, 2))                         # (S, B, I)

    kernel = _make_kernel(S, B, I, H, O)

    # Gridless single invocation; both operands are whole VMEM blocks.
    return pl.pallas_call(
        kernel,
        out_shape=jax.ShapeDtypeStruct((B, O), jnp.float32),
    )(x_tm, slab)


def reference_forward(x, params):
    """Pure-JAX reference reproducing the full PyTorch module (both layers)."""
    wih0, whh0, b0, wih1, whh1, b1, wlin, blin = params
    B = x.shape[0]
    H = whh0.shape[0]

    def cell(xin, h, c, wih, whh, b):
        g = xin @ wih + h @ whh + b
        i = jax.nn.sigmoid(g[:, :H])
        f = jax.nn.sigmoid(g[:, H:2 * H])
        gg = jnp.tanh(g[:, 2 * H:3 * H])
        o = jax.nn.sigmoid(g[:, 3 * H:])
        c = f * c + i * gg
        h = o * jnp.tanh(c)
        return h, c

    def step(carry, x_t):
        h0, c0, h1, c1 = carry
        h0, c0 = cell(x_t, h0, c0, wih0, whh0, b0)
        h1, c1 = cell(h0, h1, c1, wih1, whh1, b1)
        return (h0, c0, h1, c1), None

    init = tuple(jnp.zeros((B, H), jnp.float32) for _ in range(4))
    (h0, _, _, _), _ = jax.lax.scan(step, init, jnp.transpose(x, (1, 0, 2)))
    return h0 @ wlin + blin   # prediction = Linear(h_out[0]), exactly as PyTorch


if __name__ == "__main__":
    key = jax.random.PRNGKey(0)
    pkey, xkey = jax.random.split(key)

    # Module defaults: input_size=1, hidden_size=2, output_size=1, num_layers=2
    B, S, I = 2, 8, 1
    params = init_params(pkey, input_size=I, hidden_size=2, output_size=1)
    x = jax.random.normal(xkey, (B, S, I), jnp.float32)

    out = lstm_forecast_forward(x, params)
    out = jax.block_until_ready(out)

    ref = reference_forward(x, params)
    assert out.shape == (B, 1), out.shape
    assert jnp.allclose(out, ref, atol=1e-5, rtol=1e-5), (out, ref)
    print("KERNEL_OK")
</pallas_src>

<mosaic_0001>
module attributes {stable_mosaic.version = 11 : i64} {
  func.func @kernel(%arg0: memref<8x2x1xf32, #tpu.memory_space<vmem>>, %arg1: memref<8x8xf32, #tpu.memory_space<vmem>>, %arg2: memref<2x1xf32, #tpu.memory_space<vmem>>) attributes {dimension_semantics = [], scalar_prefetch = 0 : i64, scratch_operands = 0 : i64, tpu.core_type = #tpu.core_type<tc>} {
    %c0 = arith.constant 0 : index
    %c0_0 = arith.constant 0 : index
    %0 = vector.load %arg1[%c0, %c0_0] : memref<8x8xf32, #tpu.memory_space<vmem>>, vector<8x8xf32>
    %c0_1 = arith.constant 0 : index
    %c0_2 = arith.constant 0 : index
    %c0_3 = arith.constant 0 : index
    %1 = vector.load %arg0[%c0_1, %c0_2, %c0_3] : memref<8x2x1xf32, #tpu.memory_space<vmem>>, vector<8x2x1xf32>
    %2 = vector.extract_strided_slice %0 {offsets = [0, 0], sizes = [1, 8], strides = [1, 1]} : vector<8x8xf32> to vector<1x8xf32>
    %3 = vector.extract_strided_slice %0 {offsets = [1, 0], sizes = [1, 8], strides = [1, 1]} : vector<8x8xf32> to vector<1x8xf32>
    %4 = vector.extract_strided_slice %0 {offsets = [2, 0], sizes = [1, 8], strides = [1, 1]} : vector<8x8xf32> to vector<1x8xf32>
    %5 = vector.extract_strided_slice %0 {offsets = [3, 0], sizes = [1, 8], strides = [1, 1]} : vector<8x8xf32> to vector<1x8xf32>
    %6 = vector.extract_strided_slice %0 {offsets = [4, 0], sizes = [1, 8], strides = [1, 1]} : vector<8x8xf32> to vector<1x8xf32>
    %7 = vector.extract_strided_slice %0 {offsets = [5, 0], sizes = [1, 8], strides = [1, 1]} : vector<8x8xf32> to vector<1x8xf32>
    %8 = vector.extract_strided_slice %0 {offsets = [6, 0], sizes = [1, 8], strides = [1, 1]} : vector<8x8xf32> to vector<1x8xf32>
    %9 = vector.shape_cast %2 : vector<1x8xf32> to vector<1x1x8xf32>
    %10 = vector.broadcast %1 : vector<8x2x1xf32> to vector<8x2x8xf32>
    %11 = vector.broadcast %9 : vector<1x1x8xf32> to vector<8x2x8xf32>
    %12 = arith.mulf %10, %11 : vector<8x2x8xf32>
    %13 = vector.shape_cast %5 : vector<1x8xf32> to vector<1x1x8xf32>
    %14 = vector.broadcast %13 : vector<1x1x8xf32> to vector<8x2x8xf32>
    %15 = arith.addf %12, %14 : vector<8x2x8xf32>
    %cst = arith.constant 0.000000e+00 : f32
    %16 = vector.broadcast %cst : f32 to vector<2x2xf32>
    %cst_4 = arith.constant 0.000000e+00 : f32
    %17 = vector.broadcast %cst_4 : f32 to vector<2x2xf32>
    %18 = vector.extract_strided_slice %15 {offsets = [0, 0, 0], sizes = [1, 2, 8], strides = [1, 1, 1]} : vector<8x2x8xf32> to vector<1x2x8xf32>
    %19 = vector.shape_cast %18 : vector<1x2x8xf32> to vector<2x8xf32>
    %20 = vector.extract_strided_slice %16 {offsets = [0, 0], sizes = [2, 1], strides = [1, 1]} : vector<2x2xf32> to vector<2x1xf32>
    %21 = vector.broadcast %20 : vector<2x1xf32> to vector<2x8xf32>
    %22 = vector.broadcast %3 : vector<1x8xf32> to vector<2x8xf32>
    %23 = arith.mulf %21, %22 : vector<2x8xf32>
    %24 = arith.addf %19, %23 : vector<2x8xf32>
    %25 = vector.extract_strided_slice %16 {offsets = [0, 1], sizes = [2, 1], strides = [1, 1]} : vector<2x2xf32> to vector<2x1xf32>
    %26 = vector.broadcast %25 : vector<2x1xf32> to vector<2x8xf32>
    %27 = vector.broadcast %4 : vector<1x8xf32> to vector<2x8xf32>
    %28 = arith.mulf %26, %27 : vector<2x8xf32>
    %29 = arith.addf %24, %28 : vector<2x8xf32>
    %30 = arith.negf %29 : vector<2x8xf32>
    %31 = math.exp %30 : vector<2x8xf32>
    %cst_5 = arith.constant 1.000000e+00 : f32
    %32 = vector.broadcast %cst_5 : f32 to vector<2x8xf32>
    %33 = arith.addf %32, %31 : vector<2x8xf32>
    %34 = arith.divf %32, %33 : vector<2x8xf32>
    %35 = math.tanh %29 : vector<2x8xf32>
    %36 = vector.extract_strided_slice %34 {offsets = [0, 0], sizes = [2, 2], strides = [1, 1]} : vector<2x8xf32> to vector<2x2xf32>
    %37 = vector.extract_strided_slice %34 {offsets = [0, 2], sizes = [2, 2], strides = [1, 1]} : vector<2x8xf32> to vector<2x2xf32>
    %38 = vector.extract_strided_slice %35 {offsets = [0, 4], sizes = [2, 2], strides = [1, 1]} : vector<2x8xf32> to vector<2x2xf32>
    %39 = vector.extract_strided_slice %34 {offsets = [0, 6], sizes = [2, 2], strides = [1, 1]} : vector<2x8xf32> to vector<2x2xf32>
    %40 = arith.mulf %37, %17 : vector<2x2xf32>
    %41 = arith.mulf %36, %38 : vector<2x2xf32>
    %42 = arith.addf %40, %41 : vector<2x2xf32>
    %43 = math.tanh %42 : vector<2x2xf32>
    %44 = arith.mulf %39, %43 : vector<2x2xf32>
    %45 = vector.extract_strided_slice %15 {offsets = [1, 0, 0], sizes = [1, 2, 8], strides = [1, 1, 1]} : vector<8x2x8xf32> to vector<1x2x8xf32>
    %46 = vector.shape_cast %45 : vector<1x2x8xf32> to vector<2x8xf32>
    %47 = vector.extract_strided_slice %44 {offsets = [0, 0], sizes = [2, 1], strides = [1, 1]} : vector<2x2xf32> to vector<2x1xf32>
    %48 = vector.broadcast %47 : vector<2x1xf32> to vector<2x8xf32>
    %49 = vector.broadcast %3 : vector<1x8xf32> to vector<2x8xf32>
    %50 = arith.mulf %48, %49 : vector<2x8xf32>
    %51 = arith.addf %46, %50 : vector<2x8xf32>
    %52 = vector.extract_strided_slice %44 {offsets = [0, 1], sizes = [2, 1], strides = [1, 1]} : vector<2x2xf32> to vector<2x1xf32>
    %53 = vector.broadcast %52 : vector<2x1xf32> to vector<2x8xf32>
    %54 = vector.broadcast %4 : vector<1x8xf32> to vector<2x8xf32>
    %55 = arith.mulf %53, %54 : vector<2x8xf32>
    %56 = arith.addf %51, %55 : vector<2x8xf32>
    %57 = arith.negf %56 : vector<2x8xf32>
    %58 = math.exp %57 : vector<2x8xf32>
    %cst_6 = arith.constant 1.000000e+00 : f32
    %59 = vector.broadcast %cst_6 : f32 to vector<2x8xf32>
    %60 = arith.addf %59, %58 : vector<2x8xf32>
    %61 = arith.divf %59, %60 : vector<2x8xf32>
    %62 = math.tanh %56 : vector<2x8xf32>
    %63 = vector.extract_strided_slice %61 {offsets = [0, 0], sizes = [2, 2], strides = [1, 1]} : vector<2x8xf32> to vector<2x2xf32>
    %64 = vector.extract_strided_slice %61 {offsets = [0, 2], sizes = [2, 2], strides = [1, 1]} : vector<2x8xf32> to vector<2x2xf32>
    %65 = vector.extract_strided_slice %62 {offsets = [0, 4], sizes = [2, 2], strides = [1, 1]} : vector<2x8xf32> to vector<2x2xf32>
    %66 = vector.extract_strided_slice %61 {offsets = [0, 6], sizes = [2, 2], strides = [1, 1]} : vector<2x8xf32> to vector<2x2xf32>
    %67 = arith.mulf %64, %42 : vector<2x2xf32>
    %68 = arith.mulf %63, %65 : vector<2x2xf32>
    %69 = arith.addf %67, %68 : vector<2x2xf32>
    %70 = math.tanh %69 : vector<2x2xf32>
    %71 = arith.mulf %66, %70 : vector<2x2xf32>
    %72 = vector.extract_strided_slice %15 {offsets = [2, 0, 0], sizes = [1, 2, 8], strides = [1, 1, 1]} : vector<8x2x8xf32> to vector<1x2x8xf32>
    %73 = vector.shape_cast %72 : vector<1x2x8xf32> to vector<2x8xf32>
    %74 = vector.extract_strided_slice %71 {offsets = [0, 0], sizes = [2, 1], strides = [1, 1]} : vector<2x2xf32> to vector<2x1xf32>
    %75 = vector.broadcast %74 : vector<2x1xf32> to vector<2x8xf32>
    %76 = vector.broadcast %3 : vector<1x8xf32> to vector<2x8xf32>
    %77 = arith.mulf %75, %76 : vector<2x8xf32>
    %78 = arith.addf %73, %77 : vector<2x8xf32>
    %79 = vector.extract_strided_slice %71 {offsets = [0, 1], sizes = [2, 1], strides = [1, 1]} : vector<2x2xf32> to vector<2x1xf32>
    %80 = vector.broadcast %79 : vector<2x1xf32> to vector<2x8xf32>
    %81 = vector.broadcast %4 : vector<1x8xf32> to vector<2x8xf32>
    %82 = arith.mulf %80, %81 : vector<2x8xf32>
    %83 = arith.addf %78, %82 : vector<2x8xf32>
    %84 = arith.negf %83 : vector<2x8xf32>
    %85 = math.exp %84 : vector<2x8xf32>
    %cst_7 = arith.constant 1.000000e+00 : f32
    %86 = vector.broadcast %cst_7 : f32 to vector<2x8xf32>
    %87 = arith.addf %86, %85 : vector<2x8xf32>
    %88 = arith.divf %86, %87 : vector<2x8xf32>
    %89 = math.tanh %83 : vector<2x8xf32>
    %90 = vector.extract_strided_slice %88 {offsets = [0, 0], sizes = [2, 2], strides = [1, 1]} : vector<2x8xf32> to vector<2x2xf32>
    %91 = vector.extract_strided_slice %88 {offsets = [0, 2], sizes = [2, 2], strides = [1, 1]} : vector<2x8xf32> to vector<2x2xf32>
    %92 = vector.extract_strided_slice %89 {offsets = [0, 4], sizes = [2, 2], strides = [1, 1]} : vector<2x8xf32> to vector<2x2xf32>
    %93 = vector.extract_strided_slice %88 {offsets = [0, 6], sizes = [2, 2], strides = [1, 1]} : vector<2x8xf32> to vector<2x2xf32>
    %94 = arith.mulf %91, %69 : vector<2x2xf32>
    %95 = arith.mulf %90, %92 : vector<2x2xf32>
    %96 = arith.addf %94, %95 : vector<2x2xf32>
    %97 = math.tanh %96 : vector<2x2xf32>
    %98 = arith.mulf %93, %97 : vector<2x2xf32>
    %99 = vector.extract_strided_slice %15 {offsets = [3, 0, 0], sizes = [1, 2, 8], strides = [1, 1, 1]} : vector<8x2x8xf32> to vector<1x2x8xf32>
    %100 = vector.shape_cast %99 : vector<1x2x8xf32> to vector<2x8xf32>
    %101 = vector.extract_strided_slice %98 {offsets = [0, 0], sizes = [2, 1], strides = [1, 1]} : vector<2x2xf32> to vector<2x1xf32>
    %102 = vector.broadcast %101 : vector<2x1xf32> to vector<2x8xf32>
    %103 = vector.broadcast %3 : vector<1x8xf32> to vector<2x8xf32>
    %104 = arith.mulf %102, %103 : vector<2x8xf32>
    %105 = arith.addf %100, %104 : vector<2x8xf32>
    %106 = vector.extract_strided_slice %98 {offsets = [0, 1], sizes = [2, 1], strides = [1, 1]} : vector<2x2xf32> to vector<2x1xf32>
    %107 = vector.broadcast %106 : vector<2x1xf32> to vector<2x8xf32>
    %108 = vector.broadcast %4 : vector<1x8xf32> to vector<2x8xf32>
    %109 = arith.mulf %107, %108 : vector<2x8xf32>
    %110 = arith.addf %105, %109 : vector<2x8xf32>
    %111 = arith.negf %110 : vector<2x8xf32>
    %112 = math.exp %111 : vector<2x8xf32>
    %cst_8 = arith.constant 1.000000e+00 : f32
    %113 = vector.broadcast %cst_8 : f32 to vector<2x8xf32>
    %114 = arith.addf %113, %112 : vector<2x8xf32>
    %115 = arith.divf %113, %114 : vector<2x8xf32>
    %116 = math.tanh %110 : vector<2x8xf32>
    %117 = vector.extract_strided_slice %115 {offsets = [0, 0], sizes = [2, 2], strides = [1, 1]} : vector<2x8xf32> to vector<2x2xf32>
    %118 = vector.extract_strided_slice %115 {offsets = [0, 2], sizes = [2, 2], strides = [1, 1]} : vector<2x8xf32> to vector<2x2xf32>
    %119 = vector.extract_strided_slice %116 {offsets = [0, 4], sizes = [2, 2], strides = [1, 1]} : vector<2x8xf32> to vector<2x2xf32>
    %120 = vector.extract_strided_slice %115 {offsets = [0, 6], sizes = [2, 2], strides = [1, 1]} : vector<2x8xf32> to vector<2x2xf32>
    %121 = arith.mulf %118, %96 : vector<2x2xf32>
    %122 = arith.mulf %117, %119 : vector<2x2xf32>
    %123 = arith.addf %121, %122 : vector<2x2xf32>
    %124 = math.tanh %123 : vector<2x2xf32>
    %125 = arith.mulf %120, %124 : vector<2x2xf32>
    %126 = vector.extract_strided_slice %15 {offsets = [4, 0, 0], sizes = [1, 2, 8], strides = [1, 1, 1]} : vector<8x2x8xf32> to vector<1x2x8xf32>
    %127 = vector.shape_cast %126 : vector<1x2x8xf32> to vector<2x8xf32>
    %128 = vector.extract_strided_slice %125 {offsets = [0, 0], sizes = [2, 1], strides = [1, 1]} : vector<2x2xf32> to vector<2x1xf32>
    %129 = vector.broadcast %128 : vector<2x1xf32> to vector<2x8xf32>
    %130 = vector.broadcast %3 : vector<1x8xf32> to vector<2x8xf32>
    %131 = arith.mulf %129, %130 : vector<2x8xf32>
    %132 = arith.addf %127, %131 : vector<2x8xf32>
    %133 = vector.extract_strided_slice %125 {offsets = [0, 1], sizes = [2, 1], strides = [1, 1]} : vector<2x2xf32> to vector<2x1xf32>
    %134 = vector.broadcast %133 : vector<2x1xf32> to vector<2x8xf32>
    %135 = vector.broadcast %4 : vector<1x8xf32> to vector<2x8xf32>
    %136 = arith.mulf %134, %135 : vector<2x8xf32>
    %137 = arith.addf %132, %136 : vector<2x8xf32>
    %138 = arith.negf %137 : vector<2x8xf32>
    %139 = math.exp %138 : vector<2x8xf32>
    %cst_9 = arith.constant 1.000000e+00 : f32
    %140 = vector.broadcast %cst_9 : f32 to vector<2x8xf32>
    %141 = arith.addf %140, %139 : vector<2x8xf32>
    %142 = arith.divf %140, %141 : vector<2x8xf32>
    %143 = math.tanh %137 : vector<2x8xf32>
    %144 = vector.extract_strided_slice %142 {offsets = [0, 0], sizes = [2, 2], strides = [1, 1]} : vector<2x8xf32> to vector<2x2xf32>
    %145 = vector.extract_strided_slice %142 {offsets = [0, 2], sizes = [2, 2], strides = [1, 1]} : vector<2x8xf32> to vector<2x2xf32>
    %146 = vector.extract_strided_slice %143 {offsets = [0, 4], sizes = [2, 2], strides = [1, 1]} : vector<2x8xf32> to vector<2x2xf32>
    %147 = vector.extract_strided_slice %142 {offsets = [0, 6], sizes = [2, 2], strides = [1, 1]} : vector<2x8xf32> to vector<2x2xf32>
    %148 = arith.mulf %145, %123 : vector<2x2xf32>
    %149 = arith.mulf %144, %146 : vector<2x2xf32>
    %150 = arith.addf %148, %149 : vector<2x2xf32>
    %151 = math.tanh %150 : vector<2x2xf32>
    %152 = arith.mulf %147, %151 : vector<2x2xf32>
    %153 = vector.extract_strided_slice %15 {offsets = [5, 0, 0], sizes = [1, 2, 8], strides = [1, 1, 1]} : vector<8x2x8xf32> to vector<1x2x8xf32>
    %154 = vector.shape_cast %153 : vector<1x2x8xf32> to vector<2x8xf32>
    %155 = vector.extract_strided_slice %152 {offsets = [0, 0], sizes = [2, 1], strides = [1, 1]} : vector<2x2xf32> to vector<2x1xf32>
    %156 = vector.broadcast %155 : vector<2x1xf32> to vector<2x8xf32>
    %157 = vector.broadcast %3 : vector<1x8xf32> to vector<2x8xf32>
    %158 = arith.mulf %156, %157 : vector<2x8xf32>
    %159 = arith.addf %154, %158 : vector<2x8xf32>
    %160 = vector.extract_strided_slice %152 {offsets = [0, 1], sizes = [2, 1], strides = [1, 1]} : vector<2x2xf32> to vector<2x1xf32>
    %161 = vector.broadcast %160 : vector<2x1xf32> to vector<2x8xf32>
    %162 = vector.broadcast %4 : vector<1x8xf32> to vector<2x8xf32>
    %163 = arith.mulf %161, %162 : vector<2x8xf32>
    %164 = arith.addf %159, %163 : vector<2x8xf32>
    %165 = arith.negf %164 : vector<2x8xf32>
    %166 = math.exp %165 : vector<2x8xf32>
    %cst_10 = arith.constant 1.000000e+00 : f32
    %167 = vector.broadcast %cst_10 : f32 to vector<2x8xf32>
    %168 = arith.addf %167, %166 : vector<2x8xf32>
    %169 = arith.divf %167, %168 : vector<2x8xf32>
    %170 = math.tanh %164 : vector<2x8xf32>
    %171 = vector.extract_strided_slice %169 {offsets = [0, 0], sizes = [2, 2], strides = [1, 1]} : vector<2x8xf32> to vector<2x2xf32>
    %172 = vector.extract_strided_slice %169 {offsets = [0, 2], sizes = [2, 2], strides = [1, 1]} : vector<2x8xf32> to vector<2x2xf32>
    %173 = vector.extract_strided_slice %170 {offsets = [0, 4], sizes = [2, 2], strides = [1, 1]} : vector<2x8xf32> to vector<2x2xf32>
    %174 = vector.extract_strided_slice %169 {offsets = [0, 6], sizes = [2, 2], strides = [1, 1]} : vector<2x8xf32> to vector<2x2xf32>
    %175 = arith.mulf %172, %150 : vector<2x2xf32>
    %176 = arith.mulf %171, %173 : vector<2x2xf32>
    %177 = arith.addf %175, %176 : vector<2x2xf32>
    %178 = math.tanh %177 : vector<2x2xf32>
    %179 = arith.mulf %174, %178 : vector<2x2xf32>
    %180 = vector.extract_strided_slice %15 {offsets = [6, 0, 0], sizes = [1, 2, 8], strides = [1, 1, 1]} : vector<8x2x8xf32> to vector<1x2x8xf32>
    %181 = vector.shape_cast %180 : vector<1x2x8xf32> to vector<2x8xf32>
    %182 = vector.extract_strided_slice %179 {offsets = [0, 0], sizes = [2, 1], strides = [1, 1]} : vector<2x2xf32> to vector<2x1xf32>
    %183 = vector.broadcast %182 : vector<2x1xf32> to vector<2x8xf32>
    %184 = vector.broadcast %3 : vector<1x8xf32> to vector<2x8xf32>
    %185 = arith.mulf %183, %184 : vector<2x8xf32>
    %186 = arith.addf %181, %185 : vector<2x8xf32>
    %187 = vector.extract_strided_slice %179 {offsets = [0, 1], sizes = [2, 1], strides = [1, 1]} : vector<2x2xf32> to vector<2x1xf32>
    %188 = vector.broadcast %187 : vector<2x1xf32> to vector<2x8xf32>
    %189 = vector.broadcast %4 : vector<1x8xf32> to vector<2x8xf32>
    %190 = arith.mulf %188, %189 : vector<2x8xf32>
    %191 = arith.addf %186, %190 : vector<2x8xf32>
    %192 = arith.negf %191 : vector<2x8xf32>
    %193 = math.exp %192 : vector<2x8xf32>
    %cst_11 = arith.constant 1.000000e+00 : f32
    %194 = vector.broadcast %cst_11 : f32 to vector<2x8xf32>
    %195 = arith.addf %194, %193 : vector<2x8xf32>
    %196 = arith.divf %194, %195 : vector<2x8xf32>
    %197 = math.tanh %191 : vector<2x8xf32>
    %198 = vector.extract_strided_slice %196 {offsets = [0, 0], sizes = [2, 2], strides = [1, 1]} : vector<2x8xf32> to vector<2x2xf32>
    %199 = vector.extract_strided_slice %196 {offsets = [0, 2], sizes = [2, 2], strides = [1, 1]} : vector<2x8xf32> to vector<2x2xf32>
    %200 = vector.extract_strided_slice %197 {offsets = [0, 4], sizes = [2, 2], strides = [1, 1]} : vector<2x8xf32> to vector<2x2xf32>
    %201 = vector.extract_strided_slice %196 {offsets = [0, 6], sizes = [2, 2], strides = [1, 1]} : vector<2x8xf32> to vector<2x2xf32>
    %202 = arith.mulf %199, %177 : vector<2x2xf32>
    %203 = arith.mulf %198, %200 : vector<2x2xf32>
    %204 = arith.addf %202, %203 : vector<2x2xf32>
    %205 = math.tanh %204 : vector<2x2xf32>
    %206 = arith.mulf %201, %205 : vector<2x2xf32>
    %207 = vector.extract_strided_slice %15 {offsets = [7, 0, 0], sizes = [1, 2, 8], strides = [1, 1, 1]} : vector<8x2x8xf32> to vector<1x2x8xf32>
    %208 = vector.shape_cast %207 : vector<1x2x8xf32> to vector<2x8xf32>
    %209 = vector.extract_strided_slice %206 {offsets = [0, 0], sizes = [2, 1], strides = [1, 1]} : vector<2x2xf32> to vector<2x1xf32>
    %210 = vector.broadcast %209 : vector<2x1xf32> to vector<2x8xf32>
    %211 = vector.broadcast %3 : vector<1x8xf32> to vector<2x8xf32>
    %212 = arith.mulf %210, %211 : vector<2x8xf32>
    %213 = arith.addf %208, %212 : vector<2x8xf32>
    %214 = vector.extract_strided_slice %206 {offsets = [0, 1], sizes = [2, 1], strides = [1, 1]} : vector<2x2xf32> to vector<2x1xf32>
    %215 = vector.broadcast %214 : vector<2x1xf32> to vector<2x8xf32>
    %216 = vector.broadcast %4 : vector<1x8xf32> to vector<2x8xf32>
    %217 = arith.mulf %215, %216 : vector<2x8xf32>
    %218 = arith.addf %213, %217 : vector<2x8xf32>
    %219 = arith.negf %218 : vector<2x8xf32>
    %220 = math.exp %219 : vector<2x8xf32>
    %cst_12 = arith.constant 1.000000e+00 : f32
    %221 = vector.broadcast %cst_12 : f32 to vector<2x8xf32>
    %222 = arith.addf %221, %220 : vector<2x8xf32>
    %223 = arith.divf %221, %222 : vector<2x8xf32>
    %224 = math.tanh %218 : vector<2x8xf32>
    %225 = vector.extract_strided_slice %223 {offsets = [0, 0], sizes = [2, 2], strides = [1, 1]} : vector<2x8xf32> to vector<2x2xf32>
    %226 = vector.extract_strided_slice %223 {offsets = [0, 2], sizes = [2, 2], strides = [1, 1]} : vector<2x8xf32> to vector<2x2xf32>
    %227 = vector.extract_strided_slice %224 {offsets = [0, 4], sizes = [2, 2], strides = [1, 1]} : vector<2x8xf32> to vector<2x2xf32>
    %228 = vector.extract_strided_slice %223 {offsets = [0, 6], sizes = [2, 2], strides = [1, 1]} : vector<2x8xf32> to vector<2x2xf32>
    %229 = arith.mulf %226, %204 : vector<2x2xf32>
    %230 = arith.mulf %225, %227 : vector<2x2xf32>
    %231 = arith.addf %229, %230 : vector<2x2xf32>
    %232 = math.tanh %231 : vector<2x2xf32>
    %233 = arith.mulf %228, %232 : vector<2x2xf32>
    %234 = vector.extract_strided_slice %233 {offsets = [0, 0], sizes = [2, 1], strides = [1, 1]} : vector<2x2xf32> to vector<2x1xf32>
    %235 = vector.broadcast %234 : vector<2x1xf32> to vector<2x8xf32>
    %236 = vector.broadcast %6 : vector<1x8xf32> to vector<2x8xf32>
    %237 = arith.mulf %235, %236 : vector<2x8xf32>
    %238 = vector.broadcast %8 : vector<1x8xf32> to vector<2x8xf32>
    %239 = arith.addf %238, %237 : vector<2x8xf32>
    %240 = vector.extract_strided_slice %233 {offsets = [0, 1], sizes = [2, 1], strides = [1, 1]} : vector<2x2xf32> to vector<2x1xf32>
    %241 = vector.broadcast %240 : vector<2x1xf32> to vector<2x8xf32>
    %242 = vector.broadcast %7 : vector<1x8xf32> to vector<2x8xf32>
    %243 = arith.mulf %241, %242 : vector<2x8xf32>
    %244 = arith.addf %239, %243 : vector<2x8xf32>
    %245 = vector.extract_strided_slice %244 {offsets = [0, 0], sizes = [2, 1], strides = [1, 1]} : vector<2x8xf32> to vector<2x1xf32>
    %c0_13 = arith.constant 0 : index
    %c0_14 = arith.constant 0 : index
    %246 = vector.load %arg2[%c0_13, %c0_14] : memref<2x1xf32, #tpu.memory_space<vmem>>, vector<2x1xf32>
    tpu.vector_store %arg2[%c0_13, %c0_14], %245 {strides = array<i32>} : memref<2x1xf32, #tpu.memory_space<vmem>>, vector<2x1xf32>,
    return
  }
}

</mosaic_0001>

<bundles_post_ra>
// kernel: tpu_custom_call.1
= control target key start
LH: loop header
LB: loop body
LE: loop exit
PB: predicated region body
PF: predicated region fallthrough
CT: control target
= control target key end

     0   :  { %v593_v0 = vmov 0   ;;  %s595_s13 = smov 2   ;;  %s596_s16 = smov 4   ;;  %v597_v35 = vmov 6   ;;  %v598_v36 = vmov 7   ;;  %s739_s0 = inlined_call_operand.vmem [shape: f32[8,2,1], index: 0, kind: input, shape index: {}]   ;;  %s740_s1 = inlined_call_operand.vmem [shape: f32[8,8], index: 1, kind: input, shape index: {}]   ;;  %s741_s2 = inlined_call_operand.vmem [shape: f32[2,1], index: 2, kind: output, shape index: {}]  }
   0x1   :  { %507 = vset.pattern.permute.xlu0 %v593_v0  ;;  %v12_v1 = vld [vmem:[%s739_s0] sm:$0x3]  ;;  %508 = vset.pattern.permute.xlu2 %v593_v0  ;;  %v13_v30 = vld [vmem:[%s739_s0 + $0x2] sm:$0x3] }
   0x2   :  { %22 = vperm.xlu0 %507, %v12_v1   ;;  %v622_v2 = vld [vmem:[%s740_s1] sm:$0xff]  ;;  %s594_s1 = smov 124   ;;  %27 = vperm.xlu2 %508, %v13_v30  }
   0x3   :  { %v625_v3 = vperm.slane %v622_v2, 0  ;;  %v628_v4 = vperm.slane %v622_v2, 1  ;;  %v631_v5 = vperm.slane %v622_v2, 3  ;;  %v634_v6 = vperm.slane %v622_v2, 2  ;;  %513 = vset.pattern.permute.xlu1 %v598_v36 }
   0x5   :  { %v79_v8 = vmul.f32 0.0, %v628_v4  ;;  %v82_v10 = vmul.f32 0.0, %v634_v6 }
   0xa   :  { %509 = vset.pattern.permute.xlu2 %v597_v35  ;;  %510 = vset.pattern.permute.xlu0 %v598_v36 }
  0x5c   :  { %v28_v39 = vpop.permute.xlu2 %27 }
  0x5d   :  { %v62_v40 = vmul.f32 %v625_v3, %v28_v39 }
  0x5f   :  { %v71_v42 = vadd.f32 %v631_v5, %v62_v40 }
  0x74   :  { %v23_v7 = vpop.permute.xlu0 %22 }
  0x75   :  { %v61_v9 = vmul.f32 %v625_v3, %v23_v7 }
  0x77   :  { %v70_v11 = vadd.f32 %v631_v5, %v61_v9 }
  0x79   :  { %v80_v12 = vadd.f32 %v79_v8, %v70_v11 }
  0x7b   :  { %v83_v13 = vadd.f32 %v82_v10, %v80_v12  ;;  %v14_v10 = vld [vmem:[%s739_s0 + $0x4] sm:$0x3] }
  0x7d   :  { %529 = vtanh.f32 %v83_v13  ;;  %v493_v15 = vmul.f32 -1.442695, %v83_v13 }
  0x7f   :  { %531 = vpow2.f32 %v493_v15 }
  0x83   :  { %v530_v14 = vpop.eup %529 }
  0x84   :  { %106 = vrot.lane.b32.xlu0 %v530_v14, %s594_s1 }
  0x85   :  { %v532_v16 = vpop.eup %531 }
  0x86   :  { %v87_v17 = vadd.f32 1.0, %v532_v16 }
  0x88   :  { %533 = vrcp.f32 %v87_v17  ;;  %v99_v23 = vand.u32 2147483648, %v87_v17  ;;  %vm93_vm1 = vweird.f32 %v87_v17  ;;  %v97_v24 = vand.u32 2147483647, %v87_v17 }
  0x8a   :  { %v100_v26 = vor.u32 1.1754944e-38, %v99_v23  ;;  %vm98_vm3 = vcmp.eq.f32.partialorder %v97_v24, 8.507059e+37 }
  0x8e   :  { %v534_v18 = vpop.eup %533 }
  0x8f   :  { %v89_v19 = vmul.f32 %v534_v18, %v87_v17  ;;  %vm94_vm0 = vweird.f32 %v534_v18 }
  0x90   :  { %vm95_vm2 = vmor %vm93_vm1, %vm94_vm0 }
  0x91   :  { %v90_v20 = vsub.f32 1.0, %v89_v19 }
  0x93   :  { %v91_v21 = vmul.f32 %v534_v18, %v90_v20 }
  0x95   :  { %v92_v22 = vadd.f32 %v534_v18, %v91_v21 }
  0x97   :  { %v96_v25 = vsel %vm95_vm2, %v534_v18, %v92_v22 }
  0x98   :  { %v101_v28 = vsel %vm98_vm3, %v100_v26, %v96_v25 }
  0x99   :  { %v104_v31 = vmul.f32 0.0, %v101_v28 }
  0xf6   :  { %v107_v27 = vpop.permute.xlu0 %106 }
  0xf7   :  { %v109_v29 = vmul.f32 %v107_v27, %v101_v28 }
  0xf9   :  { %111 = vrot.lane.b32.xlu1 %v109_v29, %s595_s13 }
 0x16b   :  { %v112_v32 = vpop.permute.xlu1 %111 }
 0x16c   :  { %v114_v33 = vadd.f32 %v112_v32, %v104_v31 }
 0x16e   :  { %535 = vtanh.f32 %v114_v33 }
 0x174   :  { %v536_v34 = vpop.eup %535 }
 0x175   :  { %117 = vrot.lane.b32.xlu1 %v536_v34, %s596_s16 }
 0x1e7   :  { %v118_v37 = vpop.permute.xlu1 %117 }
 0x1e8   :  { %v120_v38 = vmul.f32 %v118_v37, %v101_v28 }
 0x1ea   :  { %129 = vperm.xlu0 %510, %v120_v38   ;;  %123 = vperm.xlu2 %509, %v120_v38  }
 0x1f2   :  { %512 = vset.pattern.permute.xlu0 %v597_v35  ;;  %511 = vset.pattern.permute.xlu2 %v593_v0 }
 0x244   :  { %v124_v41 = vpop.permute.xlu2 %123 }
 0x245   :  { %v126_v43 = vmul.f32 %v124_v41, %v628_v4 }
 0x247   :  { %v127_v45 = vadd.f32 %v126_v43, %v71_v42 }
 0x25c   :  { %v130_v44 = vpop.permute.xlu0 %129 }
 0x25d   :  { %v132_v46 = vmul.f32 %v130_v44, %v634_v6  ;;  %v15_v44 = vld [vmem:[%s739_s0 + $0x6] sm:$0x3] }
 0x25f   :  { %v133_v47 = vadd.f32 %v132_v46, %v127_v45 }
 0x261   :  { %537 = vtanh.f32 %v133_v47  ;;  %v494_v49 = vmul.f32 -1.442695, %v133_v47 }
 0x263   :  { %539 = vpow2.f32 %v494_v49 }
 0x267   :  { %v538_v48 = vpop.eup %537 }
 0x268   :  { %156 = vrot.lane.b32.xlu1 %v538_v48, %s594_s1 }
 0x269   :  { %v540_v50 = vpop.eup %539 }
 0x26a   :  { %v137_v51 = vadd.f32 1.0, %v540_v50 }
 0x26c   :  { %541 = vrcp.f32 %v137_v51  ;;  %v149_v57 = vand.u32 2147483648, %v137_v51  ;;  %vm143_vm5 = vweird.f32 %v137_v51  ;;  %v147_v58 = vand.u32 2147483647, %v137_v51 }
 0x26e   :  { %v150_v60 = vor.u32 1.1754944e-38, %v149_v57  ;;  %vm148_vm7 = vcmp.eq.f32.partialorder %v147_v58, 8.507059e+37 }
 0x272   :  { %v542_v52 = vpop.eup %541 }
 0x273   :  { %v139_v53 = vmul.f32 %v542_v52, %v137_v51  ;;  %vm144_vm4 = vweird.f32 %v542_v52 }
 0x274   :  { %vm145_vm6 = vmor %vm143_vm5, %vm144_vm4 }
 0x275   :  { %v140_v54 = vsub.f32 1.0, %v139_v53 }
 0x277   :  { %v141_v55 = vmul.f32 %v542_v52, %v140_v54 }
 0x279   :  { %v142_v56 = vadd.f32 %v542_v52, %v141_v55 }
 0x27b   :  { %v146_v59 = vsel %vm145_vm6, %v542_v52, %v142_v56 }
 0x27c   :  { %v151_v62 = vsel %vm148_vm7, %v150_v60, %v146_v59 }
 0x27d   :  { %v154_v1 = vmul.f32 %v151_v62, %v114_v33 }
 0x2da   :  { %v157_v61 = vpop.permute.xlu1 %156 }
 0x2db   :  { %v159_v63 = vmul.f32 %v157_v61, %v151_v62 }
 0x2dd   :  { %161 = vrot.lane.b32.xlu2 %v159_v63, %s595_s13 }
 0x2e5   :  { %32 = vperm.xlu2 %511, %v14_v10  }
 0x2ed   :  { %516 = vset.pattern.permute.xlu2 %v598_v36 }
 0x337   :  { %v162_v7 = vpop.permute.xlu2 %161 }
 0x338   :  { %v164_v8 = vadd.f32 %v162_v7, %v154_v1 }
 0x33a   :  { %543 = vtanh.f32 %v164_v8 }
 0x33f   :  { %v33_v13 = vpop.permute.xlu2 %32 }
 0x340   :  { %v544_v9 = vpop.eup %543  ;;  %v63_v14 = vmul.f32 %v625_v3, %v33_v13 }
 0x341   :  { %167 = vrot.lane.b32.xlu1 %v544_v9, %s596_s16 }
 0x342   :  { %v72_v15 = vadd.f32 %v631_v5, %v63_v14  ;;  %v16_v14 = vld [vmem:[%s739_s0 + $0x8] sm:$0x3] }
 0x3b3   :  { %v168_v11 = vpop.permute.xlu1 %167 }
 0x3b4   :  { %v170_v12 = vmul.f32 %v168_v11, %v151_v62 }
 0x3b6   :  { %179 = vperm.xlu1 %513, %v170_v12   ;;  %173 = vperm.xlu0 %512, %v170_v12  }
 0x3be   :  { %514 = vset.pattern.permute.xlu0 %v593_v0  ;;  %515 = vset.pattern.permute.xlu1 %v597_v35 }
 0x3bf   :  { %37 = vperm.xlu0 %514, %v15_v44  }
 0x3c7   :  { %519 = vset.pattern.permute.xlu0 %v598_v36 }
 0x428   :  { %v180_v16 = vpop.permute.xlu1 %179  ;;  %v174_v17 = vpop.permute.xlu0 %173 }
 0x429   :  { %v176_v18 = vmul.f32 %v174_v17, %v628_v4  ;;  %v182_v19 = vmul.f32 %v180_v16, %v634_v6 }
 0x42b   :  { %v177_v20 = vadd.f32 %v176_v18, %v72_v15 }
 0x42d   :  { %v183_v21 = vadd.f32 %v182_v19, %v177_v20 }
 0x42f   :  { %545 = vtanh.f32 %v183_v21  ;;  %v495_v23 = vmul.f32 -1.442695, %v183_v21 }
 0x431   :  { %547 = vpow2.f32 %v495_v23  ;;  %v38_v47 = vpop.permute.xlu0 %37 }
 0x432   :  { %v64_v48 = vmul.f32 %v625_v3, %v38_v47 }
 0x434   :  { %v73_v49 = vadd.f32 %v631_v5, %v64_v48 }
 0x435   :  { %v546_v22 = vpop.eup %545 }
 0x436   :  { %206 = vrot.lane.b32.xlu2 %v546_v22, %s594_s1 }
 0x437   :  { %v548_v24 = vpop.eup %547 }
 0x438   :  { %v187_v25 = vadd.f32 1.0, %v548_v24 }
 0x43a   :  { %549 = vrcp.f32 %v187_v25  ;;  %v199_v31 = vand.u32 2147483648, %v187_v25  ;;  %vm193_vm9 = vweird.f32 %v187_v25  ;;  %v197_v32 = vand.u32 2147483647, %v187_v25 }
 0x43c   :  { %v200_v34 = vor.u32 1.1754944e-38, %v199_v31  ;;  %vm198_vm11 = vcmp.eq.f32.partialorder %v197_v32, 8.507059e+37 }
 0x440   :  { %v550_v26 = vpop.eup %549 }
 0x441   :  { %v189_v27 = vmul.f32 %v550_v26, %v187_v25  ;;  %vm194_vm8 = vweird.f32 %v550_v26 }
 0x442   :  { %vm195_vm10 = vmor %vm193_vm9, %vm194_vm8 }
 0x443   :  { %v190_v28 = vsub.f32 1.0, %v189_v27 }
 0x445   :  { %v191_v29 = vmul.f32 %v550_v26, %v190_v28 }
 0x447   :  { %v192_v30 = vadd.f32 %v550_v26, %v191_v29 }
 0x449   :  { %v196_v33 = vsel %vm195_vm10, %v550_v26, %v192_v30 }
 0x44a   :  { %v201_v38 = vsel %vm198_vm11, %v200_v34, %v196_v33 }
 0x44b   :  { %v204_v40 = vmul.f32 %v201_v38, %v164_v8 }
 0x490   :  { %v207_v37 = vpop.permute.xlu2 %206 }
 0x491   :  { %v209_v39 = vmul.f32 %v207_v37, %v201_v38 }
 0x493   :  { %211 = vrot.lane.b32.xlu1 %v209_v39, %s595_s13 }
 0x505   :  { %v212_v41 = vpop.permute.xlu1 %211 }
 0x506   :  { %v214_v42 = vadd.f32 %v212_v41, %v204_v40 }
 0x508   :  { %551 = vtanh.f32 %v214_v42 }
 0x50e   :  { %v552_v43 = vpop.eup %551 }
 0x50f   :  { %217 = vrot.lane.b32.xlu2 %v552_v43, %s596_s16 }
 0x569   :  { %v218_v45 = vpop.permute.xlu2 %217 }
 0x56a   :  { %v220_v46 = vmul.f32 %v218_v45, %v201_v38 }
 0x56c   :  { %229 = vperm.xlu2 %516, %v220_v46   ;;  %223 = vperm.xlu1 %515, %v220_v46  }
 0x574   :  { %517 = vset.pattern.permute.xlu1 %v593_v0  ;;  %518 = vset.pattern.permute.xlu2 %v597_v35 }
 0x5c6   :  { %v230_v50 = vpop.permute.xlu2 %229 }
 0x5c7   :  { %v232_v53 = vmul.f32 %v230_v50, %v634_v6 }
 0x5de   :  { %v224_v51 = vpop.permute.xlu1 %223 }
 0x5df   :  { %v226_v52 = vmul.f32 %v224_v51, %v628_v4 }
 0x5e1   :  { %v227_v54 = vadd.f32 %v226_v52, %v73_v49  ;;  %v17_v52 = vld [vmem:[%s739_s0 + $0xa] sm:$0x3] }
 0x5e3   :  { %v233_v55 = vadd.f32 %v232_v53, %v227_v54 }
 0x5e5   :  { %553 = vtanh.f32 %v233_v55  ;;  %v496_v57 = vmul.f32 -1.442695, %v233_v55 }
 0x5e7   :  { %555 = vpow2.f32 %v496_v57 }
 0x5eb   :  { %v554_v56 = vpop.eup %553 }
 0x5ec   :  { %256 = vrot.lane.b32.xlu1 %v554_v56, %s594_s1 }
 0x5ed   :  { %v556_v58 = vpop.eup %555 }
 0x5ee   :  { %v237_v59 = vadd.f32 1.0, %v556_v58 }
 0x5f0   :  { %557 = vrcp.f32 %v237_v59  ;;  %v249_v7 = vand.u32 2147483648, %v237_v59  ;;  %vm243_vm13 = vweird.f32 %v237_v59  ;;  %v247_v8 = vand.u32 2147483647, %v237_v59 }
 0x5f2   :  { %v250_v10 = vor.u32 1.1754944e-38, %v249_v7  ;;  %vm248_vm15 = vcmp.eq.f32.partialorder %v247_v8, 8.507059e+37 }
 0x5f4   :  { %42 = vperm.xlu1 %517, %v16_v14  }
 0x5f6   :  { %v558_v60 = vpop.eup %557 }
 0x5f7   :  { %v239_v61 = vmul.f32 %v558_v60, %v237_v59  ;;  %vm244_vm12 = vweird.f32 %v558_v60 }
 0x5f8   :  { %vm245_vm14 = vmor %vm243_vm13, %vm244_vm12 }
 0x5f9   :  { %v240_v62 = vsub.f32 1.0, %v239_v61 }
 0x5fb   :  { %v241_v63 = vmul.f32 %v558_v60, %v240_v62 }
 0x5fc   :  { %522 = vset.pattern.permute.xlu1 %v598_v36 }
 0x5fd   :  { %v242_v1 = vadd.f32 %v558_v60, %v241_v63 }
 0x5ff   :  { %v246_v9 = vsel %vm245_vm14, %v558_v60, %v242_v1 }
 0x600   :  { %v251_v12 = vsel %vm248_vm15, %v250_v10, %v246_v9 }
 0x601   :  { %v254_v15 = vmul.f32 %v251_v12, %v214_v42 }
 0x65e   :  { %v257_v11 = vpop.permute.xlu1 %256 }
 0x65f   :  { %v259_v13 = vmul.f32 %v257_v11, %v251_v12 }
 0x661   :  { %261 = vrot.lane.b32.xlu2 %v259_v13, %s595_s13 }
 0x666   :  { %v43_v21 = vpop.permute.xlu1 %42 }
 0x667   :  { %v65_v22 = vmul.f32 %v625_v3, %v43_v21 }
 0x669   :  { %v74_v24 = vadd.f32 %v631_v5, %v65_v22 }
 0x6bb   :  { %v262_v16 = vpop.permute.xlu2 %261 }
 0x6bc   :  { %v264_v17 = vadd.f32 %v262_v16, %v254_v15 }
 0x6be   :  { %559 = vtanh.f32 %v264_v17 }
 0x6c4   :  { %v560_v18 = vpop.eup %559 }
 0x6c5   :  { %267 = vrot.lane.b32.xlu0 %v560_v18, %s596_s16 }
 0x737   :  { %v268_v19 = vpop.permute.xlu0 %267 }
 0x738   :  { %v270_v20 = vmul.f32 %v268_v19, %v251_v12 }
 0x73a   :  { %279 = vperm.xlu0 %519, %v270_v20   ;;  %273 = vperm.xlu2 %518, %v270_v20  }
 0x742   :  { %521 = vset.pattern.permute.xlu0 %v597_v35  ;;  %520 = vset.pattern.permute.xlu2 %v593_v0 }
 0x794   :  { %v274_v23 = vpop.permute.xlu2 %273 }
 0x795   :  { %v276_v25 = vmul.f32 %v274_v23, %v628_v4 }
 0x797   :  { %v277_v27 = vadd.f32 %v276_v25, %v74_v24 }
 0x7ac   :  { %v280_v26 = vpop.permute.xlu0 %279 }
 0x7ad   :  { %v282_v28 = vmul.f32 %v280_v26, %v634_v6  ;;  %v18_v26 = vld [vmem:[%s739_s0 + $0xc] sm:$0x3] }
 0x7af   :  { %v283_v29 = vadd.f32 %v282_v28, %v277_v27 }
 0x7b1   :  { %561 = vtanh.f32 %v283_v29  ;;  %v497_v31 = vmul.f32 -1.442695, %v283_v29 }
 0x7b3   :  { %563 = vpow2.f32 %v497_v31 }
 0x7b7   :  { %v562_v30 = vpop.eup %561 }
 0x7b8   :  { %306 = vrot.lane.b32.xlu1 %v562_v30, %s594_s1 }
 0x7b9   :  { %v564_v32 = vpop.eup %563 }
 0x7ba   :  { %v287_v33 = vadd.f32 1.0, %v564_v32 }
 0x7bc   :  { %565 = vrcp.f32 %v287_v33  ;;  %v299_v41 = vand.u32 2147483648, %v287_v33  ;;  %vm293_vm1 = vweird.f32 %v287_v33  ;;  %v297_v42 = vand.u32 2147483647, %v287_v33 }
 0x7be   :  { %v300_v44 = vor.u32 1.1754944e-38, %v299_v41  ;;  %vm298_vm3 = vcmp.eq.f32.partialorder %v297_v42, 8.507059e+37 }
 0x7c2   :  { %v566_v34 = vpop.eup %565 }
 0x7c3   :  { %v289_v37 = vmul.f32 %v566_v34, %v287_v33  ;;  %vm294_vm0 = vweird.f32 %v566_v34 }
 0x7c4   :  { %vm295_vm2 = vmor %vm293_vm1, %vm294_vm0  ;;  %vm487_vm0 = vcmask 1024  }
 0x7c5   :  { %v290_v38 = vsub.f32 1.0, %v289_v37 }
 0x7c7   :  { %v291_v39 = vmul.f32 %v566_v34, %v290_v38 }
 0x7c9   :  { %v292_v40 = vadd.f32 %v566_v34, %v291_v39 }
 0x7cb   :  { %v296_v43 = vsel %vm295_vm2, %v566_v34, %v292_v40 }
 0x7cc   :  { %v301_v46 = vsel %vm298_vm3, %v300_v44, %v296_v43 }
 0x7cd   :  { %v304_v48 = vmul.f32 %v301_v46, %v264_v17 }
 0x82a   :  { %v307_v45 = vpop.permute.xlu1 %306 }
 0x82b   :  { %v309_v47 = vmul.f32 %v307_v45, %v301_v46 }
 0x82d   :  { %311 = vrot.lane.b32.xlu2 %v309_v47, %s595_s13 }
 0x835   :  { %47 = vperm.xlu2 %520, %v17_v52  }
 0x83d   :  { %525 = vset.pattern.permute.xlu2 %v598_v36 }
 0x887   :  { %v312_v49 = vpop.permute.xlu2 %311 }
 0x888   :  { %v314_v50 = vadd.f32 %v312_v49, %v304_v48 }
 0x88a   :  { %567 = vtanh.f32 %v314_v50 }
 0x88f   :  { %v48_v55 = vpop.permute.xlu2 %47 }
 0x890   :  { %v568_v51 = vpop.eup %567  ;;  %v66_v56 = vmul.f32 %v625_v3, %v48_v55 }
 0x891   :  { %317 = vrot.lane.b32.xlu1 %v568_v51, %s596_s16 }
 0x892   :  { %v75_v57 = vadd.f32 %v631_v5, %v66_v56 }
 0x903   :  { %v318_v53 = vpop.permute.xlu1 %317 }
 0x904   :  { %v320_v54 = vmul.f32 %v318_v53, %v301_v46  ;;  %v19_v53 = vld [vmem:[%s739_s0 + $0xe] sm:$0x3] }
 0x906   :  { %329 = vperm.xlu1 %522, %v320_v54   ;;  %323 = vperm.xlu0 %521, %v320_v54  }
 0x90e   :  { %523 = vset.pattern.permute.xlu0 %v593_v0  ;;  %524 = vset.pattern.permute.xlu1 %v597_v35 }
 0x90f   :  { %52 = vperm.xlu0 %523, %v18_v26  }
 0x917   :  { %528 = vset.pattern.permute.xlu0 %v598_v36 }
 0x978   :  { %v330_v58 = vpop.permute.xlu1 %329  ;;  %v324_v59 = vpop.permute.xlu0 %323 }
 0x979   :  { %v326_v60 = vmul.f32 %v324_v59, %v628_v4  ;;  %v332_v61 = vmul.f32 %v330_v58, %v634_v6 }
 0x97b   :  { %v327_v62 = vadd.f32 %v326_v60, %v75_v57 }
 0x97d   :  { %v333_v63 = vadd.f32 %v332_v61, %v327_v62 }
 0x97f   :  { %569 = vtanh.f32 %v333_v63  ;;  %v498_v7 = vmul.f32 -1.442695, %v333_v63 }
 0x981   :  { %571 = vpow2.f32 %v498_v7  ;;  %v53_v29 = vpop.permute.xlu0 %52 }
 0x982   :  { %v67_v30 = vmul.f32 %v625_v3, %v53_v29  ;;  %v476_v29 = vperm.slane %v622_v2, 4 }
 0x984   :  { %v76_v31 = vadd.f32 %v631_v5, %v67_v30 }
 0x985   :  { %v570_v1 = vpop.eup %569 }
 0x986   :  { %356 = vrot.lane.b32.xlu2 %v570_v1, %s594_s1 }
 0x987   :  { %v572_v8 = vpop.eup %571 }
 0x988   :  { %v337_v9 = vadd.f32 1.0, %v572_v8 }
 0x98a   :  { %573 = vrcp.f32 %v337_v9  ;;  %v349_v15 = vand.u32 2147483648, %v337_v9  ;;  %vm343_vm5 = vweird.f32 %v337_v9  ;;  %v347_v16 = vand.u32 2147483647, %v337_v9 }
 0x98c   :  { %v350_v18 = vor.u32 1.1754944e-38, %v349_v15  ;;  %vm348_vm7 = vcmp.eq.f32.partialorder %v347_v16, 8.507059e+37 }
 0x990   :  { %v574_v10 = vpop.eup %573 }
 0x991   :  { %v339_v11 = vmul.f32 %v574_v10, %v337_v9  ;;  %vm344_vm4 = vweird.f32 %v574_v10 }
 0x992   :  { %vm345_vm6 = vmor %vm343_vm5, %vm344_vm4 }
 0x993   :  { %v340_v12 = vsub.f32 1.0, %v339_v11 }
 0x995   :  { %v341_v13 = vmul.f32 %v574_v10, %v340_v12 }
 0x997   :  { %v342_v14 = vadd.f32 %v574_v10, %v341_v13 }
 0x999   :  { %v346_v17 = vsel %vm345_vm6, %v574_v10, %v342_v14 }
 0x99a   :  { %v351_v20 = vsel %vm348_vm7, %v350_v18, %v346_v17 }
 0x99b   :  { %v354_v22 = vmul.f32 %v351_v20, %v314_v50 }
 0x9e0   :  { %v357_v19 = vpop.permute.xlu2 %356 }
 0x9e1   :  { %v359_v21 = vmul.f32 %v357_v19, %v351_v20 }
 0x9e3   :  { %361 = vrot.lane.b32.xlu1 %v359_v21, %s595_s13 }
 0xa55   :  { %v362_v23 = vpop.permute.xlu1 %361 }
 0xa56   :  { %v364_v24 = vadd.f32 %v362_v23, %v354_v22 }
 0xa58   :  { %575 = vtanh.f32 %v364_v24 }
 0xa5e   :  { %v576_v25 = vpop.eup %575 }
 0xa5f   :  { %367 = vrot.lane.b32.xlu2 %v576_v25, %s596_s16 }
 0xab9   :  { %v368_v27 = vpop.permute.xlu2 %367 }
 0xaba   :  { %v370_v28 = vmul.f32 %v368_v27, %v351_v20 }
 0xabc   :  { %379 = vperm.xlu2 %525, %v370_v28   ;;  %373 = vperm.xlu1 %524, %v370_v28  }
 0xac4   :  { %526 = vset.pattern.permute.xlu1 %v593_v0  ;;  %527 = vset.pattern.permute.xlu2 %v597_v35 }
 0xb16   :  { %v380_v32 = vpop.permute.xlu2 %379 }
 0xb17   :  { %v382_v37 = vmul.f32 %v380_v32, %v634_v6 }
 0xb2e   :  { %v374_v33 = vpop.permute.xlu1 %373 }
 0xb2f   :  { %v376_v34 = vmul.f32 %v374_v33, %v628_v4  ;;  %v484_v33 = vperm.slane %v622_v2, 5 }
 0xb31   :  { %v377_v36 = vadd.f32 %v376_v34, %v76_v31  ;;  %v478_v31 = vperm.slane %v622_v2, 6 }
 0xb33   :  { %v383_v38 = vadd.f32 %v382_v37, %v377_v36 }
 0xb35   :  { %577 = vtanh.f32 %v383_v38  ;;  %v499_v0 = vmul.f32 -1.442695, %v383_v38 }
 0xb37   :  { %579 = vpow2.f32 %v499_v0 }
 0xb3b   :  { %v578_v39 = vpop.eup %577 }
 0xb3c   :  { %406 = vrot.lane.b32.xlu1 %v578_v39, %s594_s1 }
 0xb3d   :  { %v580_v35 = vpop.eup %579 }
 0xb3e   :  { %v387_v40 = vadd.f32 1.0, %v580_v35 }
 0xb40   :  { %581 = vrcp.f32 %v387_v40  ;;  %v399_v46 = vand.u32 2147483648, %v387_v40  ;;  %vm393_vm9 = vweird.f32 %v387_v40  ;;  %v397_v47 = vand.u32 2147483647, %v387_v40 }
 0xb42   :  { %v400_v49 = vor.u32 1.1754944e-38, %v399_v46  ;;  %vm398_vm11 = vcmp.eq.f32.partialorder %v397_v47, 8.507059e+37 }
 0xb44   :  { %57 = vperm.xlu1 %526, %v19_v53  }
 0xb46   :  { %v582_v41 = vpop.eup %581 }
 0xb47   :  { %v389_v42 = vmul.f32 %v582_v41, %v387_v40  ;;  %vm394_vm8 = vweird.f32 %v582_v41 }
 0xb48   :  { %vm395_vm10 = vmor %vm393_vm9, %vm394_vm8 }
 0xb49   :  { %v390_v43 = vsub.f32 1.0, %v389_v42 }
 0xb4b   :  { %v391_v44 = vmul.f32 %v582_v41, %v390_v43 }
 0xb4d   :  { %v392_v45 = vadd.f32 %v582_v41, %v391_v44 }
 0xb4f   :  { %v396_v48 = vsel %vm395_vm10, %v582_v41, %v392_v45 }
 0xb50   :  { %v401_v51 = vsel %vm398_vm11, %v400_v49, %v396_v48 }
 0xb51   :  { %v404_v54 = vmul.f32 %v401_v51, %v364_v24 }
 0xbae   :  { %v407_v50 = vpop.permute.xlu1 %406 }
 0xbaf   :  { %v409_v52 = vmul.f32 %v407_v50, %v401_v51 }
 0xbb1   :  { %411 = vrot.lane.b32.xlu2 %v409_v52, %s595_s13 }
 0xbb6   :  { %v58_v60 = vpop.permute.xlu1 %57 }
 0xbb7   :  { %v68_v61 = vmul.f32 %v625_v3, %v58_v60 }
 0xbb9   :  { %v77_v63 = vadd.f32 %v631_v5, %v68_v61 }
 0xc0b   :  { %v412_v55 = vpop.permute.xlu2 %411 }
 0xc0c   :  { %v414_v56 = vadd.f32 %v412_v55, %v404_v54 }
 0xc0e   :  { %583 = vtanh.f32 %v414_v56 }
 0xc14   :  { %v584_v57 = vpop.eup %583 }
 0xc15   :  { %417 = vrot.lane.b32.xlu0 %v584_v57, %s596_s16 }
 0xc87   :  { %v418_v58 = vpop.permute.xlu0 %417 }
 0xc88   :  { %v420_v59 = vmul.f32 %v418_v58, %v401_v51 }
 0xc8a   :  { %429 = vperm.xlu0 %528, %v420_v59   ;;  %423 = vperm.xlu2 %527, %v420_v59  }
 0xce4   :  { %v424_v62 = vpop.permute.xlu2 %423 }
 0xce5   :  { %v426_v1 = vmul.f32 %v424_v62, %v628_v4 }
 0xce7   :  { %v427_v8 = vadd.f32 %v426_v1, %v77_v63 }
 0xcfc   :  { %v430_v7 = vpop.permute.xlu0 %429 }
 0xcfd   :  { %v432_v9 = vmul.f32 %v430_v7, %v634_v6 }
 0xcff   :  { %v433_v10 = vadd.f32 %v432_v9, %v427_v8 }
 0xd01   :  { %585 = vtanh.f32 %v433_v10  ;;  %v500_v12 = vmul.f32 -1.442695, %v433_v10 }
 0xd03   :  { %587 = vpow2.f32 %v500_v12 }
 0xd07   :  { %v586_v11 = vpop.eup %585 }
 0xd08   :  { %456 = vrot.lane.b32.xlu1 %v586_v11, %s594_s1 }
 0xd09   :  { %v588_v13 = vpop.eup %587 }
 0xd0a   :  { %v437_v14 = vadd.f32 1.0, %v588_v13 }
 0xd0c   :  { %589 = vrcp.f32 %v437_v14  ;;  %v449_v4 = vand.u32 2147483648, %v437_v14  ;;  %vm443_vm13 = vweird.f32 %v437_v14  ;;  %v447_v18 = vand.u32 2147483647, %v437_v14 }
 0xd0e   :  { %v450_v19 = vor.u32 1.1754944e-38, %v449_v4  ;;  %vm448_vm15 = vcmp.eq.f32.partialorder %v447_v18, 8.507059e+37 }
 0xd12   :  { %v590_v3 = vpop.eup %589 }
 0xd13   :  { %v439_v15 = vmul.f32 %v590_v3, %v437_v14  ;;  %vm444_vm12 = vweird.f32 %v590_v3 }
 0xd14   :  { %vm445_vm14 = vmor %vm443_vm13, %vm444_vm12 }
 0xd15   :  { %v440_v16 = vsub.f32 1.0, %v439_v15 }
 0xd17   :  { %v441_v5 = vmul.f32 %v590_v3, %v440_v16 }
 0xd19   :  { %v442_v17 = vadd.f32 %v590_v3, %v441_v5 }
 0xd1b   :  { %v446_v6 = vsel %vm445_vm14, %v590_v3, %v442_v17 }
 0xd1c   :  { %v451_v21 = vsel %vm448_vm15, %v450_v19, %v446_v6 }
 0xd1d   :  { %v454_v23 = vmul.f32 %v451_v21, %v414_v56 }
 0xd7a   :  { %v457_v20 = vpop.permute.xlu1 %456 }
 0xd7b   :  { %v459_v22 = vmul.f32 %v457_v20, %v451_v21 }
 0xd7d   :  { %461 = vrot.lane.b32.xlu2 %v459_v22, %s595_s13 }
 0xdd7   :  { %v462_v24 = vpop.permute.xlu2 %461 }
 0xdd8   :  { %v464_v25 = vadd.f32 %v462_v24, %v454_v23 }
 0xdda   :  { %591 = vtanh.f32 %v464_v25 }
 0xde0   :  { %v592_v26 = vpop.eup %591 }
 0xde1   :  { %467 = vrot.lane.b32.xlu1 %v592_v26, %s596_s16 }
 0xe53   :  { %v468_v27 = vpop.permute.xlu1 %467 }
 0xe54   :  { %v470_v28 = vmul.f32 %v468_v27, %v451_v21 }
 0xe56   :  { %481 = vperm.xlu0 %528, %v470_v28   ;;  %473 = vperm.xlu2 %527, %v470_v28  }
 0xeb0   :  { %v474_v30 = vpop.permute.xlu2 %473 }
 0xeb1   :  { %v477_v32 = vmul.f32 %v476_v29, %v474_v30 }
 0xeb3   :  { %v479_v37 = vadd.f32 %v478_v31, %v477_v32 }
 0xec8   :  { %v482_v34 = vpop.permute.xlu0 %481 }
 0xec9   :  { %v485_v36 = vmul.f32 %v484_v33, %v482_v34 }
 0xecb   :  { %v486_v38 = vadd.f32 %v485_v36, %v479_v37 }
 0xecd   :  { %488 = vst.msk [vmem:[%s741_s2] sm:$0x3] %vm487_vm0, %v486_v38 }

</bundles_post_ra>
